<compile_context>
chip_gen: v5e
topology: v5e:2x2
jax: 0.10.0
libtpu: 0.0.40
codegen_flags: <defaults>
</compile_context>

<pallas_src>
import jax
import jax.numpy as jnp
from jax.experimental import pallas as pl
from jax.experimental.pallas import tpu as pltpu


def _make_dense_block_kernel(c_in, growth_rate, num_layers, L):
    """Builds the fused DenseBlock kernel for static (c_in, G, num_layers, L)."""
    G = growth_rate

    def kernel(x_ref, *refs):
        # x_ref:   (1, C_in, L)  one sample, NCL (PyTorch layout, L on lanes)
        # per layer i (4 refs): scale (c_i, 1), shift (c_i, 1),
        #                       w (3G, c_i) bf16 fused taps, b (G, 1)
        # o_ref:   (1, C_total, L) -- also used as the dense-concat feature slab
        o_ref = refs[-1]
        layer_refs = refs[:-1]

        # Stage the input channels into the output slab (in-place dense concat).
        o_ref[0, 0:c_in, :] = x_ref[0].astype(o_ref.dtype)

        zero_col = jnp.zeros((G, 1), jnp.float32)

        c = c_in
        for i in range(num_layers):
            scale_ref, shift_ref, w_ref, b_ref = layer_refs[4 * i:4 * i + 4]

            x = o_ref[0, 0:c, :]                                   # (c, L) f32
            # BatchNorm (inference, folded) + ReLU in f32 (scale/shift broadcast
            # along the L lane axis).
            xr = jnp.maximum(x * scale_ref[...] + shift_ref[...], 0.0)

            # Single MXU push per layer: (3G, c) @ (c, L) -> (3G, L),
            # bf16 operands, f32 accumulation.  Row group k = tap k.
            z = jnp.dot(w_ref[...], xr.astype(jnp.bfloat16),
                        preferred_element_type=jnp.float32)        # (3G, L)
            z0 = z[0:G, :]
            z1 = z[G:2 * G, :]
            z2 = z[2 * G:3 * G, :]

            # y[:, l] = z0[:, l-1] + z1[:, l] + z2[:, l+1], zero beyond the ends
            # (== Conv1d padding=1).  Zero-padded lane shifts via slice+concat
            # (no negative roll, no full-size boundary masks).
            y_prev = jnp.concatenate([zero_col, z0[:, :L - 1]], axis=1)
            y_next = jnp.concatenate([z2[:, 1:], zero_col], axis=1)
            y = z1 + y_prev + y_next + b_ref[...]

            # nn.Dropout: identity in inference mode.
            o_ref[0, c:c + G, :] = y.astype(o_ref.dtype)
            c += G

    return kernel


def init_dense_block_params(key, in_channels, growth_rate, num_layers, eps=1e-5):
    """Deterministic synthetic parameters; BN folded, conv taps fused to (3G, C)."""
    params = []
    G = growth_rate
    for i in range(num_layers):
        c_in = in_channels + i * G
        key, k1, k2, k3, k4, k5, k6 = jax.random.split(key, 7)
        gamma = jax.random.uniform(k1, (c_in,), jnp.float32, 0.5, 1.5)
        beta = 0.1 * jax.random.normal(k2, (c_in,), jnp.float32)
        running_mean = 0.1 * jax.random.normal(k3, (c_in,), jnp.float32)
        running_var = jax.random.uniform(k4, (c_in,), jnp.float32, 0.5, 1.5)
        # PyTorch Conv1d weight layout: (out=G, in=C, k=3).
        w_torch = (jax.random.normal(k5, (G, c_in, 3), jnp.float32)
                   / jnp.sqrt(3.0 * c_in))
        b = 0.05 * jax.random.normal(k6, (G,), jnp.float32)

        scale = gamma / jnp.sqrt(running_var + eps)
        shift = beta - running_mean * scale
        # Fuse taps along the output-row dim: (3G, C); row group k = tap k
        # (tap k multiplies x[l + k - 1]).  Stored bf16 for the MXU.
        w_fused = jnp.transpose(w_torch, (2, 0, 1)).reshape(3 * G, c_in)
        params.append({
            "scale": scale,
            "shift": shift,
            "w": w_fused.astype(jnp.bfloat16),
            "b": b,
        })
    return params


def dense_block_forward(x_ncl, params):
    """Matches DenseBlock.forward (dense channel concatenation), NCL in/out."""
    N, C_in, L = x_ncl.shape
    G = params[0]["b"].shape[0]
    num_layers = len(params)
    C_total = C_in + num_layers * G

    kernel = _make_dense_block_kernel(C_in, G, num_layers, L)

    # Input / output: one sample per grid step, NCL layout kept as-is.
    in_specs = [pl.BlockSpec((1, C_in, L), lambda n: (n, 0, 0))]
    args = [x_ncl]
    # Per-layer parameters: grid-invariant, whole-array VMEM residents
    # (single-buffered -- no revolving pipeline buffers).
    vmem_spec = pl.BlockSpec(memory_space=pltpu.MemorySpace.VMEM)
    for p in params:
        c_i = p["scale"].shape[0]
        in_specs += [vmem_spec, vmem_spec, vmem_spec, vmem_spec]
        args += [p["scale"].reshape(c_i, 1), p["shift"].reshape(c_i, 1),
                 p["w"], p["b"].reshape(G, 1)]

    flops = 2 * N * L * sum((C_in + i * G) * 3 * G for i in range(num_layers))
    bytes_accessed = (
        int(x_ncl.size) * x_ncl.dtype.itemsize
        + N * L * C_total * x_ncl.dtype.itemsize
        + sum(int(a.size) * a.dtype.itemsize for a in args[1:]))

    out = pl.pallas_call(
        kernel,
        out_shape=jax.ShapeDtypeStruct((N, C_total, L), x_ncl.dtype),
        grid=(N,),
        in_specs=in_specs,
        out_specs=pl.BlockSpec((1, C_total, L), lambda n: (n, 0, 0)),
        compiler_params=pltpu.CompilerParams(dimension_semantics=("parallel",)),
        cost_estimate=pl.CostEstimate(flops=flops, transcendentals=0,
                                      bytes_accessed=bytes_accessed),
    )(*args)
    return out


def _reference_forward(x_ncl, params):
    """Pure-JAX reference (NCL).  Mirrors the kernel's bf16 MXU operands."""
    feats = [x_ncl]
    for p in params:
        x = jnp.concatenate(feats, axis=1)                          # (N, C, L)
        xn = x * p["scale"][None, :, None] + p["shift"][None, :, None]
        xr = jnp.maximum(xn, 0.0).astype(jnp.bfloat16)
        G = p["b"].shape[0]
        L = x.shape[-1]
        xp = jnp.pad(xr, ((0, 0), (0, 0), (1, 1)))
        y = sum(jnp.einsum("gc,ncl->ngl", p["w"][k * G:(k + 1) * G, :],
                           xp[:, :, k:k + L],
                           preferred_element_type=jnp.float32)
                for k in range(3))
        y = y + p["b"][None, :, None]
        feats.append(y.astype(x_ncl.dtype))
    return jnp.concatenate(feats, axis=1)


if __name__ == "__main__":
    in_channels, growth_rate, num_layers = 4, 4, 3
    N, L = 2, 16

    key = jax.random.PRNGKey(0)
    key, kx = jax.random.split(key)
    x = jax.random.normal(kx, (N, in_channels, L), jnp.float32)   # PyTorch NCL

    params = init_dense_block_params(key, in_channels, growth_rate, num_layers)

    out = jax.block_until_ready(dense_block_forward(x, params))
    expected_channels = in_channels + num_layers * growth_rate
    assert out.shape == (N, expected_channels, L), out.shape

    ref = jax.block_until_ready(_reference_forward(x, params))
    # Tolerance loosened for bf16 matmul operands (f32 accumulation).
    assert jnp.allclose(out, ref, atol=2e-2, rtol=2e-2), "mismatch vs reference"

    print("KERNEL_OK")
</pallas_src>

<mosaic_0001>
module attributes {stable_mosaic.version = 11 : i64} {
  func.func @kernel(%arg0: i32, %arg1: memref<1x4x16xf32, #tpu.memory_space<vmem>>, %arg2: memref<4x1xf32, #tpu.memory_space<vmem>>, %arg3: memref<4x1xf32, #tpu.memory_space<vmem>>, %arg4: memref<12x4xbf16, #tpu.memory_space<vmem>>, %arg5: memref<4x1xf32, #tpu.memory_space<vmem>>, %arg6: memref<8x1xf32, #tpu.memory_space<vmem>>, %arg7: memref<8x1xf32, #tpu.memory_space<vmem>>, %arg8: memref<12x8xbf16, #tpu.memory_space<vmem>>, %arg9: memref<4x1xf32, #tpu.memory_space<vmem>>, %arg10: memref<12x1xf32, #tpu.memory_space<vmem>>, %arg11: memref<12x1xf32, #tpu.memory_space<vmem>>, %arg12: memref<12x12xbf16, #tpu.memory_space<vmem>>, %arg13: memref<4x1xf32, #tpu.memory_space<vmem>>, %arg14: memref<1x16x16xf32, #tpu.memory_space<vmem>>) attributes {dimension_semantics = [#tpu.dimension_semantics<parallel>], iteration_bounds = array<i64: 2>, scalar_prefetch = 0 : i64, scratch_operands = 0 : i64, tpu.core_type = #tpu.core_type<tc>, window_params = [{transform_indices = @transform_0, window_bounds = array<i64: 1, 4, 16>}, {pipeline_mode = #tpu.pipeline_mode<synchronous>, transform_indices = @transform_1, window_bounds = array<i64: 4, 1>}, {pipeline_mode = #tpu.pipeline_mode<synchronous>, transform_indices = @transform_2, window_bounds = array<i64: 4, 1>}, {pipeline_mode = #tpu.pipeline_mode<synchronous>, transform_indices = @transform_3, window_bounds = array<i64: 12, 4>}, {pipeline_mode = #tpu.pipeline_mode<synchronous>, transform_indices = @transform_4, window_bounds = array<i64: 4, 1>}, {pipeline_mode = #tpu.pipeline_mode<synchronous>, transform_indices = @transform_5, window_bounds = array<i64: 8, 1>}, {pipeline_mode = #tpu.pipeline_mode<synchronous>, transform_indices = @transform_6, window_bounds = array<i64: 8, 1>}, {pipeline_mode = #tpu.pipeline_mode<synchronous>, transform_indices = @transform_7, window_bounds = array<i64: 12, 8>}, {pipeline_mode = #tpu.pipeline_mode<synchronous>, transform_indices = @transform_8, window_bounds = array<i64: 4, 1>}, {pipeline_mode = #tpu.pipeline_mode<synchronous>, transform_indices = @transform_9, window_bounds = array<i64: 12, 1>}, {pipeline_mode = #tpu.pipeline_mode<synchronous>, transform_indices = @transform_10, window_bounds = array<i64: 12, 1>}, {pipeline_mode = #tpu.pipeline_mode<synchronous>, transform_indices = @transform_11, window_bounds = array<i64: 12, 12>}, {pipeline_mode = #tpu.pipeline_mode<synchronous>, transform_indices = @transform_12, window_bounds = array<i64: 4, 1>}, {transform_indices = @transform_13, window_bounds = array<i64: 1, 16, 16>}]} {
    %c0 = arith.constant 0 : index
    %c0_0 = arith.constant 0 : index
    %c0_1 = arith.constant 0 : index
    %0 = vector.load %arg1[%c0, %c0_0, %c0_1] : memref<1x4x16xf32, #tpu.memory_space<vmem>>, vector<1x4x16xf32>
    %1 = vector.shape_cast %0 : vector<1x4x16xf32> to vector<4x16xf32>
    %c0_2 = arith.constant 0 : index
    %c0_3 = arith.constant 0 : index
    %c0_4 = arith.constant 0 : index
    %2 = vector.load %arg14[%c0_2, %c0_3, %c0_4] : memref<1x16x16xf32, #tpu.memory_space<vmem>>, vector<1x4x16xf32>
    %3 = vector.shape_cast %2 : vector<1x4x16xf32> to vector<4x16xf32>
    %4 = vector.shape_cast %1 : vector<4x16xf32> to vector<1x4x16xf32>
    tpu.vector_store %arg14[%c0_2, %c0_3, %c0_4], %4 {strides = array<i32>} : memref<1x16x16xf32, #tpu.memory_space<vmem>>, vector<1x4x16xf32>,
    %cst = arith.constant 0.000000e+00 : f32
    %5 = vector.broadcast %cst : f32 to vector<4x1xf32>
    %c0_5 = arith.constant 0 : index
    %c0_6 = arith.constant 0 : index
    %c0_7 = arith.constant 0 : index
    %6 = vector.load %arg14[%c0_5, %c0_6, %c0_7] : memref<1x16x16xf32, #tpu.memory_space<vmem>>, vector<1x4x16xf32>
    %7 = vector.shape_cast %6 : vector<1x4x16xf32> to vector<4x16xf32>
    %c0_8 = arith.constant 0 : index
    %c0_9 = arith.constant 0 : index
    %8 = vector.load %arg2[%c0_8, %c0_9] : memref<4x1xf32, #tpu.memory_space<vmem>>, vector<4x1xf32>
    %9 = vector.broadcast %8 : vector<4x1xf32> to vector<4x16xf32>
    %10 = arith.mulf %7, %9 : vector<4x16xf32>
    %c0_10 = arith.constant 0 : index
    %c0_11 = arith.constant 0 : index
    %11 = vector.load %arg3[%c0_10, %c0_11] : memref<4x1xf32, #tpu.memory_space<vmem>>, vector<4x1xf32>
    %12 = vector.broadcast %11 : vector<4x1xf32> to vector<4x16xf32>
    %13 = arith.addf %10, %12 : vector<4x16xf32>
    %cst_12 = arith.constant 0.000000e+00 : f32
    %14 = vector.broadcast %cst_12 : f32 to vector<4x16xf32>
    %15 = arith.maximumf %13, %14 : vector<4x16xf32>
    %c0_13 = arith.constant 0 : index
    %c0_14 = arith.constant 0 : index
    %16 = vector.load %arg4[%c0_13, %c0_14] : memref<12x4xbf16, #tpu.memory_space<vmem>>, vector<12x4xbf16>
    %17 = arith.truncf %15 : vector<4x16xf32> to vector<4x16xbf16>
    %cst_15 = arith.constant dense<0.000000e+00> : vector<12x16xf32>
    %18 = tpu.matmul %16, %17, %cst_15 {dimension_numbers = #tpu.dot_dimension_numbers<[1], [0], [0], [1], [0, 0, 1, 1], [], []>} : vector<12x4xbf16>, vector<4x16xbf16>, vector<12x16xf32> -> vector<12x16xf32>
    %19 = vector.extract_strided_slice %18 {offsets = [0, 0], sizes = [4, 16], strides = [1, 1]} : vector<12x16xf32> to vector<4x16xf32>
    %20 = vector.extract_strided_slice %18 {offsets = [4, 0], sizes = [4, 16], strides = [1, 1]} : vector<12x16xf32> to vector<4x16xf32>
    %21 = vector.extract_strided_slice %18 {offsets = [8, 0], sizes = [4, 16], strides = [1, 1]} : vector<12x16xf32> to vector<4x16xf32>
    %22 = vector.extract_strided_slice %19 {offsets = [0, 0], sizes = [4, 15], strides = [1, 1]} : vector<4x16xf32> to vector<4x15xf32>
    %23 = tpu.concatenate %5, %22 in 1 : vector<4x1xf32>, vector<4x15xf32> -> vector<4x16xf32>
    %24 = vector.extract_strided_slice %21 {offsets = [0, 1], sizes = [4, 15], strides = [1, 1]} : vector<4x16xf32> to vector<4x15xf32>
    %25 = tpu.concatenate %24, %5 in 1 : vector<4x15xf32>, vector<4x1xf32> -> vector<4x16xf32>
    %26 = arith.addf %20, %23 : vector<4x16xf32>
    %27 = arith.addf %26, %25 : vector<4x16xf32>
    %c0_16 = arith.constant 0 : index
    %c0_17 = arith.constant 0 : index
    %28 = vector.load %arg5[%c0_16, %c0_17] : memref<4x1xf32, #tpu.memory_space<vmem>>, vector<4x1xf32>
    %29 = vector.broadcast %28 : vector<4x1xf32> to vector<4x16xf32>
    %30 = arith.addf %27, %29 : vector<4x16xf32>
    %c0_18 = arith.constant 0 : index
    %c4 = arith.constant 4 : index
    %c0_19 = arith.constant 0 : index
    %31 = vector.load %arg14[%c0_18, %c4, %c0_19] : memref<1x16x16xf32, #tpu.memory_space<vmem>>, vector<1x4x16xf32>
    %32 = vector.shape_cast %31 : vector<1x4x16xf32> to vector<4x16xf32>
    %33 = vector.shape_cast %30 : vector<4x16xf32> to vector<1x4x16xf32>
    tpu.vector_store %arg14[%c0_18, %c4, %c0_19], %33 {strides = array<i32>} : memref<1x16x16xf32, #tpu.memory_space<vmem>>, vector<1x4x16xf32>,
    %c0_20 = arith.constant 0 : index
    %c0_21 = arith.constant 0 : index
    %c0_22 = arith.constant 0 : index
    %34 = vector.load %arg14[%c0_20, %c0_21, %c0_22] : memref<1x16x16xf32, #tpu.memory_space<vmem>>, vector<1x8x16xf32>
    %35 = vector.shape_cast %34 : vector<1x8x16xf32> to vector<8x16xf32>
    %c0_23 = arith.constant 0 : index
    %c0_24 = arith.constant 0 : index
    %36 = vector.load %arg6[%c0_23, %c0_24] : memref<8x1xf32, #tpu.memory_space<vmem>>, vector<8x1xf32>
    %37 = vector.broadcast %36 : vector<8x1xf32> to vector<8x16xf32>
    %38 = arith.mulf %35, %37 : vector<8x16xf32>
    %c0_25 = arith.constant 0 : index
    %c0_26 = arith.constant 0 : index
    %39 = vector.load %arg7[%c0_25, %c0_26] : memref<8x1xf32, #tpu.memory_space<vmem>>, vector<8x1xf32>
    %40 = vector.broadcast %39 : vector<8x1xf32> to vector<8x16xf32>
    %41 = arith.addf %38, %40 : vector<8x16xf32>
    %cst_27 = arith.constant 0.000000e+00 : f32
    %42 = vector.broadcast %cst_27 : f32 to vector<8x16xf32>
    %43 = arith.maximumf %41, %42 : vector<8x16xf32>
    %c0_28 = arith.constant 0 : index
    %c0_29 = arith.constant 0 : index
    %44 = vector.load %arg8[%c0_28, %c0_29] : memref<12x8xbf16, #tpu.memory_space<vmem>>, vector<12x8xbf16>
    %45 = arith.truncf %43 : vector<8x16xf32> to vector<8x16xbf16>
    %cst_30 = arith.constant dense<0.000000e+00> : vector<12x16xf32>
    %46 = tpu.matmul %44, %45, %cst_30 {dimension_numbers = #tpu.dot_dimension_numbers<[1], [0], [0], [1], [0, 0, 1, 1], [], []>} : vector<12x8xbf16>, vector<8x16xbf16>, vector<12x16xf32> -> vector<12x16xf32>
    %47 = vector.extract_strided_slice %46 {offsets = [0, 0], sizes = [4, 16], strides = [1, 1]} : vector<12x16xf32> to vector<4x16xf32>
    %48 = vector.extract_strided_slice %46 {offsets = [4, 0], sizes = [4, 16], strides = [1, 1]} : vector<12x16xf32> to vector<4x16xf32>
    %49 = vector.extract_strided_slice %46 {offsets = [8, 0], sizes = [4, 16], strides = [1, 1]} : vector<12x16xf32> to vector<4x16xf32>
    %50 = vector.extract_strided_slice %47 {offsets = [0, 0], sizes = [4, 15], strides = [1, 1]} : vector<4x16xf32> to vector<4x15xf32>
    %51 = tpu.concatenate %5, %50 in 1 : vector<4x1xf32>, vector<4x15xf32> -> vector<4x16xf32>
    %52 = vector.extract_strided_slice %49 {offsets = [0, 1], sizes = [4, 15], strides = [1, 1]} : vector<4x16xf32> to vector<4x15xf32>
    %53 = tpu.concatenate %52, %5 in 1 : vector<4x15xf32>, vector<4x1xf32> -> vector<4x16xf32>
    %54 = arith.addf %48, %51 : vector<4x16xf32>
    %55 = arith.addf %54, %53 : vector<4x16xf32>
    %c0_31 = arith.constant 0 : index
    %c0_32 = arith.constant 0 : index
    %56 = vector.load %arg9[%c0_31, %c0_32] : memref<4x1xf32, #tpu.memory_space<vmem>>, vector<4x1xf32>
    %57 = vector.broadcast %56 : vector<4x1xf32> to vector<4x16xf32>
    %58 = arith.addf %55, %57 : vector<4x16xf32>
    %c0_33 = arith.constant 0 : index
    %c8 = arith.constant 8 : index
    %c0_34 = arith.constant 0 : index
    %59 = vector.load %arg14[%c0_33, %c8, %c0_34] : memref<1x16x16xf32, #tpu.memory_space<vmem>>, vector<1x4x16xf32>
    %60 = vector.shape_cast %59 : vector<1x4x16xf32> to vector<4x16xf32>
    %61 = vector.shape_cast %58 : vector<4x16xf32> to vector<1x4x16xf32>
    tpu.vector_store %arg14[%c0_33, %c8, %c0_34], %61 {strides = array<i32>} : memref<1x16x16xf32, #tpu.memory_space<vmem>>, vector<1x4x16xf32>,
    %c0_35 = arith.constant 0 : index
    %c0_36 = arith.constant 0 : index
    %c0_37 = arith.constant 0 : index
    %62 = vector.load %arg14[%c0_35, %c0_36, %c0_37] : memref<1x16x16xf32, #tpu.memory_space<vmem>>, vector<1x12x16xf32>
    %63 = vector.shape_cast %62 : vector<1x12x16xf32> to vector<12x16xf32>
    %c0_38 = arith.constant 0 : index
    %c0_39 = arith.constant 0 : index
    %64 = vector.load %arg10[%c0_38, %c0_39] : memref<12x1xf32, #tpu.memory_space<vmem>>, vector<12x1xf32>
    %65 = vector.broadcast %64 : vector<12x1xf32> to vector<12x16xf32>
    %66 = arith.mulf %63, %65 : vector<12x16xf32>
    %c0_40 = arith.constant 0 : index
    %c0_41 = arith.constant 0 : index
    %67 = vector.load %arg11[%c0_40, %c0_41] : memref<12x1xf32, #tpu.memory_space<vmem>>, vector<12x1xf32>
    %68 = vector.broadcast %67 : vector<12x1xf32> to vector<12x16xf32>
    %69 = arith.addf %66, %68 : vector<12x16xf32>
    %cst_42 = arith.constant 0.000000e+00 : f32
    %70 = vector.broadcast %cst_42 : f32 to vector<12x16xf32>
    %71 = arith.maximumf %69, %70 : vector<12x16xf32>
    %c0_43 = arith.constant 0 : index
    %c0_44 = arith.constant 0 : index
    %72 = vector.load %arg12[%c0_43, %c0_44] : memref<12x12xbf16, #tpu.memory_space<vmem>>, vector<12x12xbf16>
    %73 = arith.truncf %71 : vector<12x16xf32> to vector<12x16xbf16>
    %cst_45 = arith.constant dense<0.000000e+00> : vector<12x16xf32>
    %74 = tpu.matmul %72, %73, %cst_45 {dimension_numbers = #tpu.dot_dimension_numbers<[1], [0], [0], [1], [0, 0, 1, 1], [], []>} : vector<12x12xbf16>, vector<12x16xbf16>, vector<12x16xf32> -> vector<12x16xf32>
    %75 = vector.extract_strided_slice %74 {offsets = [0, 0], sizes = [4, 16], strides = [1, 1]} : vector<12x16xf32> to vector<4x16xf32>
    %76 = vector.extract_strided_slice %74 {offsets = [4, 0], sizes = [4, 16], strides = [1, 1]} : vector<12x16xf32> to vector<4x16xf32>
    %77 = vector.extract_strided_slice %74 {offsets = [8, 0], sizes = [4, 16], strides = [1, 1]} : vector<12x16xf32> to vector<4x16xf32>
    %78 = vector.extract_strided_slice %75 {offsets = [0, 0], sizes = [4, 15], strides = [1, 1]} : vector<4x16xf32> to vector<4x15xf32>
    %79 = tpu.concatenate %5, %78 in 1 : vector<4x1xf32>, vector<4x15xf32> -> vector<4x16xf32>
    %80 = vector.extract_strided_slice %77 {offsets = [0, 1], sizes = [4, 15], strides = [1, 1]} : vector<4x16xf32> to vector<4x15xf32>
    %81 = tpu.concatenate %80, %5 in 1 : vector<4x15xf32>, vector<4x1xf32> -> vector<4x16xf32>
    %82 = arith.addf %76, %79 : vector<4x16xf32>
    %83 = arith.addf %82, %81 : vector<4x16xf32>
    %c0_46 = arith.constant 0 : index
    %c0_47 = arith.constant 0 : index
    %84 = vector.load %arg13[%c0_46, %c0_47] : memref<4x1xf32, #tpu.memory_space<vmem>>, vector<4x1xf32>
    %85 = vector.broadcast %84 : vector<4x1xf32> to vector<4x16xf32>
    %86 = arith.addf %83, %85 : vector<4x16xf32>
    %c0_48 = arith.constant 0 : index
    %c12 = arith.constant 12 : index
    %c0_49 = arith.constant 0 : index
    %87 = vector.load %arg14[%c0_48, %c12, %c0_49] : memref<1x16x16xf32, #tpu.memory_space<vmem>>, vector<1x4x16xf32>
    %88 = vector.shape_cast %87 : vector<1x4x16xf32> to vector<4x16xf32>
    %89 = vector.shape_cast %86 : vector<4x16xf32> to vector<1x4x16xf32>
    tpu.vector_store %arg14[%c0_48, %c12, %c0_49], %89 {strides = array<i32>} : memref<1x16x16xf32, #tpu.memory_space<vmem>>, vector<1x4x16xf32>,
    return
  }
  func.func @transform_0(%arg0: i32) -> (i32, i32, i32) {
    %c0_i32 = arith.constant 0 : i32
    %c0_i32_0 = arith.constant 0 : i32
    %c0_i32_1 = arith.constant 0 : i32
    return %arg0, %c0_i32, %c0_i32_0 : i32, i32, i32
  }
  func.func @transform_1(%arg0: i32) -> (i32, i32) {
    %c0_i32 = arith.constant 0 : i32
    %c0_i32_0 = arith.constant 0 : i32
    %c0_i32_1 = arith.constant 0 : i32
    return %c0_i32, %c0_i32_0 : i32, i32
  }
  func.func @transform_2(%arg0: i32) -> (i32, i32) {
    %c0_i32 = arith.constant 0 : i32
    %c0_i32_0 = arith.constant 0 : i32
    %c0_i32_1 = arith.constant 0 : i32
    return %c0_i32, %c0_i32_0 : i32, i32
  }
  func.func @transform_3(%arg0: i32) -> (i32, i32) {
    %c0_i32 = arith.constant 0 : i32
    %c0_i32_0 = arith.constant 0 : i32
    %c0_i32_1 = arith.constant 0 : i32
    return %c0_i32, %c0_i32_0 : i32, i32
  }
  func.func @transform_4(%arg0: i32) -> (i32, i32) {
    %c0_i32 = arith.constant 0 : i32
    %c0_i32_0 = arith.constant 0 : i32
    %c0_i32_1 = arith.constant 0 : i32
    return %c0_i32, %c0_i32_0 : i32, i32
  }
  func.func @transform_5(%arg0: i32) -> (i32, i32) {
    %c0_i32 = arith.constant 0 : i32
    %c0_i32_0 = arith.constant 0 : i32
    %c0_i32_1 = arith.constant 0 : i32
    return %c0_i32, %c0_i32_0 : i32, i32
  }
  func.func @transform_6(%arg0: i32) -> (i32, i32) {
    %c0_i32 = arith.constant 0 : i32
    %c0_i32_0 = arith.constant 0 : i32
    %c0_i32_1 = arith.constant 0 : i32
    return %c0_i32, %c0_i32_0 : i32, i32
  }
  func.func @transform_7(%arg0: i32) -> (i32, i32) {
    %c0_i32 = arith.constant 0 : i32
    %c0_i32_0 = arith.constant 0 : i32
    %c0_i32_1 = arith.constant 0 : i32
    return %c0_i32, %c0_i32_0 : i32, i32
  }
  func.func @transform_8(%arg0: i32) -> (i32, i32) {
    %c0_i32 = arith.constant 0 : i32
    %c0_i32_0 = arith.constant 0 : i32
    %c0_i32_1 = arith.constant 0 : i32
    return %c0_i32, %c0_i32_0 : i32, i32
  }
  func.func @transform_9(%arg0: i32) -> (i32, i32) {
    %c0_i32 = arith.constant 0 : i32
    %c0_i32_0 = arith.constant 0 : i32
    %c0_i32_1 = arith.constant 0 : i32
    return %c0_i32, %c0_i32_0 : i32, i32
  }
  func.func @transform_10(%arg0: i32) -> (i32, i32) {
    %c0_i32 = arith.constant 0 : i32
    %c0_i32_0 = arith.constant 0 : i32
    %c0_i32_1 = arith.constant 0 : i32
    return %c0_i32, %c0_i32_0 : i32, i32
  }
  func.func @transform_11(%arg0: i32) -> (i32, i32) {
    %c0_i32 = arith.constant 0 : i32
    %c0_i32_0 = arith.constant 0 : i32
    %c0_i32_1 = arith.constant 0 : i32
    return %c0_i32, %c0_i32_0 : i32, i32
  }
  func.func @transform_12(%arg0: i32) -> (i32, i32) {
    %c0_i32 = arith.constant 0 : i32
    %c0_i32_0 = arith.constant 0 : i32
    %c0_i32_1 = arith.constant 0 : i32
    return %c0_i32, %c0_i32_0 : i32, i32
  }
  func.func @transform_13(%arg0: i32) -> (i32, i32, i32) {
    %c0_i32 = arith.constant 0 : i32
    %c0_i32_0 = arith.constant 0 : i32
    %c0_i32_1 = arith.constant 0 : i32
    return %arg0, %c0_i32, %c0_i32_0 : i32, i32, i32
  }
}

</mosaic_0001>

<bundles_post_ra>
// kernel: tpu_custom_call.1
= control target key start
LH: loop header
LB: loop body
LE: loop exit
PB: predicated region body
PF: predicated region fallthrough
CT: control target
= control target key end

     0   :  { %s1137_s0 = inlined_call_operand.vmem [shape: f32[2,4,16], index: 0, kind: input, shape index: {}]   ;;  %s1138_s1 = inlined_call_operand.vmem [shape: f32[4,1], index: 1, kind: input, shape index: {}]   ;;  %s1139_s2 = inlined_call_operand.vmem [shape: f32[4,1], index: 2, kind: input, shape index: {}]   ;;  %s1140_s3 = inlined_call_operand.vmem [shape: bf16[12,4], index: 3, kind: input, shape index: {}]   ;;  %s1141_s4 = inlined_call_operand.vmem [shape: f32[4,1], index: 4, kind: input, shape index: {}]   ;;  %s1142_s5 = inlined_call_operand.vmem [shape: f32[8,1], index: 5, kind: input, shape index: {}]   ;;  %s1143_s6 = inlined_call_operand.vmem [shape: f32[8,1], index: 6, kind: input, shape index: {}]   ;;  %s1144_s7 = inlined_call_operand.vmem [shape: bf16[12,8], index: 7, kind: input, shape index: {}]   ;;  %s1145_s8 = inlined_call_operand.vmem [shape: f32[4,1], index: 8, kind: input, shape index: {}]   ;;  %s1146_s9 = inlined_call_operand.vmem [shape: f32[12,1], index: 9, kind: input, shape index: {}]   ;;  %s1147_s10 = inlined_call_operand.vmem [shape: f32[12,1], index: 10, kind: input, shape index: {}]   ;;  %s1148_s11 = inlined_call_operand.vmem [shape: bf16[12,12], index: 11, kind: input, shape index: {}]   ;;  %s1149_s12 = inlined_call_operand.vmem [shape: f32[4,1], index: 12, kind: input, shape index: {}]   ;;  %s1150_s13 = inlined_call_operand.hbm [shape: f32[2,16,16], index: 13, kind: output, shape index: {}]  }
   0x1   :  { %1152 = sst [smem:[#allocation6_spill]] %s1138_s1 }
   0x2   :  { %1153 = sst [smem:[#allocation7_spill]] %s1139_s2 }
   0x3   :  { %18 = vsyncpa [#allocation3], 0 }
   0x4   :  { %20 = vsyncpa [#allocation3 + $0x1], 0  ;;  %s972_s25 = smov 0   ;;  %s974_s26 = smov 0  }
   0x5   :  { %s976_s27 = smov 0   ;;  %s978_s28 = smov 0  }
   0x6 LB: > { %s993_s29 = sadd.s32 4294967295, %s895_s28   ;;  %s756_s30 = sadd.s32 4294967294, %s895_s28   ;;  %s895_s28 = sphi %s978_s28, %s1164_s28   ;;  %s891_s27 = sphi %s976_s27, %s1163_s27   ;;  %s887_s26 = sphi %s974_s26, %s1162_s26   ;;  %s883_s25 = sphi %s972_s25, %s1161_s25  }
   0x7   : > { %s997_s14 = sadd.s32 1, %s895_s28   ;;  %s311_s15 = sadd.s32 1, %s891_s27 }
   0x8   : > { %s308_s16 = ssub.s32 %s895_s28, %s997_s14  ;;  %p321_p0 = scmp.ne.s32.totalorder %s891_s27, %s887_s26 }
   0x9   : > { %p309_p1 = scmp.eq.s32.totalorder %s308_s16, 0  ;;  %p322_p2 = scmp.eq.s32.totalorder %s993_s29, 1 }
   0xa   : > { %p327_p3 = scmp.ne.s32.totalorder %s887_s26, %s883_s25  ;;  %p328_p4 = scmp.eq.s32.totalorder %s756_s30, 1 }
   0xb   : > { %s1008_s17 = scalar_select %p309_p1, %s891_s27, %s311_s15  }
   0xc   : > { %p1010_p5 = por %p322_p2, %p321_p0  ;;  %p1014_p6 = por %p328_p4, %p327_p3 }
   0xd   : > { %1154 = sst [smem:[#allocation5_spill]] %s1008_s17  ;;  %p759_p7 = scmp.ge.s32.totalorder %s895_s28, 1 }
   0xe   : > { %p389_p8 = scmp.lt.s32.totalorder %s895_s28, 3 }
  0x10   : > { %p390_p9 = pnand %p759_p7, %p389_p8 }
  0x11   : > { %s1157_s1 = sld [smem:[#allocation6_spill]] (!%p390_p9)  ;;  %p432_p10 = scmp.lt.s32.totalorder (!%p390_p9), %s993_s29, 1 }
  0x12   : > { %393 = sbr.rel (%p390_p9) target bundleno = 970 (0x3ca), region = 72  ;;  %s1158_s2 = sld [smem:[#allocation7_spill]] (!%p390_p9) }
  0x13   : > { %s1151_s22 = sand.u32 (!%p390_p9), 1, %s887_s26   ;;  %s785_s16 = sshll.u32 (!%p390_p9), %s993_s29, 4 }
  0x14   : > { %s853_s17 = scalar_lea.hbm (!%p390_p9), %s1150_s13, 32 }
  0x17   : > { %v441_v0 = vld [vmem:[%s1157_s1] sm:$0xf]  ;;  %v897_v1 = vmov 0   ;;  %s433_s1 = scalar_select %p432_p10, %s993_s29, 1  ;;  %vm438_vm0 = vcmask 125952   ;;  %vm468_vm1 = vcmask 1041408  }
  0x18   : > { %830 = vset.pattern.permute.xlu0 %v897_v1  ;;  %831 = vset.pattern.permute.xlu2 %v897_v1  ;;  %v448_v2 = vld [vmem:[%s1158_s2] sm:$0xf]  ;;  %s760_s2 = sshll.u32 %s1151_s22, 4  ;;  %v782_v14 = vld [vmem:[%s1140_s3] sm:$0x30]  ;;  %vm464_vm2 = vcmask 31744  }
  0x19   : > { %444 = vperm.xlu0 %830, %v441_v0   ;;  %832 = vset.pattern.permute.xlu1 %v897_v1  ;;  %v524_v3 = vld [vmem:[%s1143_s6] sm:$0xff]  ;;  %s761_s23 = sshll.u32 %s433_s1, 2  ;;  %s1043_s15 = scalar_lea.vmem [#allocation2], %s760_s2  ;;  %vm490_vm3 = vcmask 7168   ;;  %vm496_vm4 = vcmask 121856   ;;  %vm514_vm5 = vcmask 130052  }
  0x1a   : > { %v580_v4 = vld [vmem:[%s1145_s8] sm:$0xf]  ;;  %s435_s30 = scalar_lea.vmem %s1137_s0, %s761_s23  ;;  %s899_s1 = smov 127   ;;  %vm544_vm6 = vcmask 1043456   ;;  %v783_v40 = vld [vmem:[%s1144_s7] sm:$0x30] }
  0x1b   : > { %v605_v5 = vld [vmem:[%s1147_s10] sm:$0xff]  ;;  %vm540_vm7 = vcmask 64512   ;;  %v606_v47 = vld [vmem:[%s1147_s10 + $0x8] sm:$0xf]  ;;  %vm633_vm8 = vcmask 1045504   ;;  %vm629_vm9 = vcmask 97280   ;;  %s690_s2 = scalar_lea.hbm %s1150_s13, %s785_s16 }
  0x1c   : > { %v437_v6 = vld [vmem:[%s435_s30] sm:$0xf]  ;;  %s898_s30 = smov 1   ;;  %v592_v48 = vld [vmem:[%s1146_s9 + $0x8] sm:$0xf]  ;;  %s1159_s29 = sand.u32 1, %s887_s26  }
  0x1d   : > { %439 = vst.msk [vmem:[%s1043_s15] sm:$0xf] %vm438_vm0, %v437_v6  ;;  %v764_v13 = vld [vmem:[%s1140_s3] sm:$0xf]  ;;  %s679_s22 = scalar_lea.sflag [#allocation3], %s1159_s29 }
  0x1e   : > { %v765_v17 = vor.u32 %v782_v14, %v764_v13  ;;  %v506_v18 = vld [vmem:[%s1141_s4] sm:$0xf] }
  0x1f   : > { %509 = vperm.xlu2 %831, %v506_v18   ;;  %v517_v19 = vld [vmem:[%s1142_s5] sm:$0xff] }
  0x20   : > { %v769_v39 = vld [vmem:[%s1144_s7] sm:$0xf] }
  0x21   : > { %451 = vperm.xlu0 %830, %v448_v2   ;;  %v770_v43 = vor.u32 %v783_v40, %v769_v39  ;;  %v591_v45 = vld [vmem:[%s1146_s9] sm:$0xff] }
  0x22   : > { %v669_v49 = vld [vmem:[%s1149_s12] sm:$0xf] }
  0x24   : > { %v440_v8 = vld [vmem:[%s1043_s15] sm:$0xf] }
  0x27   : > { %520 = vperm.xlu2 %831, %v517_v19  }
  0x29   : > { %527 = vperm.xlu0 %830, %v524_v3  }
  0x31   : > { %583 = vperm.xlu0 %830, %v580_v4  }
  0x39   : > { %609 = vperm.xlu0 %830, %v605_v5  }
  0x79   : > { %v510_v26 = vpop.permute.xlu2 %509 }
  0x7a   : > { %v511_v29 = vrot.slane %v510_v26, 4 }
  0x81   : > { %v521_v33 = vpop.permute.xlu2 %520 }
  0x8b   : > { %v445_v7 = vpop.permute.xlu0 %444 }
  0x8c   : > { %v447_v9 = vmul.f32 %v445_v7, %v440_v8  ;;  %v774_v8 = vld [vmem:[%s1148_s11] sm:$0xf] }
  0x93   : > { %v452_v10 = vpop.permute.xlu0 %451 }
  0x94   : > { %v454_v11 = vadd.f32 %v452_v10, %v447_v9  ;;  %v784_v9 = vld [vmem:[%s1148_s11] sm:$0x30] }
  0x96   : > { %v455_v12 = vmax.f32 %v454_v11, 0.0 }
  0x98   : > { %v458_v15 = vpack.c.bf16 %v455_v12, %v455_v12  ;;  %v775_v12 = vor.u32 %v784_v9, %v774_v8 }
  0x9a   : > { %v470_v16 = vsel %vm468_vm1, %v458_v15, 0 }
  0x9b   : > { %479 = vmatpush.bf16.msra.mxu0 %v470_v16  ;;  %v528_v36 = vpop.permute.xlu0 %527 }
  0x9e   : > { %766 = vmatmul.msk.bf16.vlgmr.msra.gmra.mxu0 %vm464_vm2, %v765_v17 }
  0xa3   : > { %v584_v55 = vpop.permute.xlu0 %583 }
  0xa4   : > { %v585_v58 = vrot.slane %v584_v55, 4 }
  0xab   : > { %v610_v63 = vpop.permute.xlu0 %609 }
 0x11b   : > { %v481_v20 = vpop.f32.mrf.mxu0 }
 0x11c   : > { %487 = vrot.lane.b32.xlu1 %v481_v20, %s898_s30 }
 0x123   : > { %v483_v21 = vpop.f32.mrf.mxu0 }
 0x124   : > { %493 = vrot.lane.b32.xlu1 %v483_v21, %s899_s1 }
 0x18e   : > { %v488_v22 = vpop.permute.xlu1 %487 }
 0x18f   : > { %v491_v23 = vsel %vm490_vm3, 0.0, %v488_v22 }
 0x190   : > { %v499_v24 = vrot.slane %v491_v23, 4 }
 0x192   : > { %v501_v28 = vadd.f32 %v499_v24, %v481_v20 }
 0x196   : > { %v494_v25 = vpop.permute.xlu1 %493 }
 0x197   : > { %v497_v27 = vsel %vm496_vm4, %v494_v25, 0.0 }
 0x198   : > { %v503_v30 = vrot.slane %v497_v27, 4 }
 0x19a   : > { %v505_v31 = vadd.f32 %v503_v30, %v501_v28 }
 0x19c   : > { %v513_v32 = vadd.f32 %v511_v29, %v505_v31 }
 0x19e   : > { %515 = vst.msk [vmem:[%s1043_s15] sm:$0xf0] %vm514_vm5, %v513_v32 }
 0x1a5   : > { %v516_v34 = vld [vmem:[%s1043_s15] sm:$0xff] }
 0x1a6   : > { %v523_v35 = vmul.f32 %v521_v33, %v516_v34 }
 0x1a8   : > { %v530_v37 = vadd.f32 %v528_v36, %v523_v35 }
 0x1aa   : > { %v531_v38 = vmax.f32 %v530_v37, 0.0 }
 0x1ac   : > { %v534_v41 = vpack.c.bf16 %v531_v38, %v531_v38 }
 0x1ae   : > { %v546_v42 = vsel %vm544_vm6, %v534_v41, 0 }
 0x1af   : > { %555 = vmatpush.bf16.msra.mxu1 %v546_v42 }
 0x1b2   : > { %771 = vmatmul.msk.bf16.vlgmr.msra.gmra.mxu1 %vm540_vm7, %v770_v43 }
 0x22f   : > { %v557_v44 = vpop.f32.mrf.mxu1 }
 0x230   : > { %563 = vrot.lane.b32.xlu1 %v557_v44, %s898_s30 }
 0x237   : > { %v559_v46 = vpop.f32.mrf.mxu1 }
 0x238   : > { %595 = vperm.xlu1 %832, %v591_v45   ;;  %568 = vrot.lane.b32.xlu2 %v559_v46, %s899_s1 }
 0x240   : > { %614 = vperm.xlu1 %832, %v606_v47   ;;  %600 = vperm.xlu2 %831, %v592_v48  }
 0x248   : > { %672 = vperm.xlu1 %832, %v669_v49  }
 0x292   : > { %v569_v50 = vpop.permute.xlu2 %568 }
 0x293   : > { %v571_v52 = vsel %vm496_vm4, %v569_v50, 0.0 }
 0x294   : > { %v577_v56 = vrot.slane %v571_v52, 4 }
 0x29a   : > { %v601_v0 = vpop.permute.xlu2 %600 }
 0x2a2   : > { %v564_v51 = vpop.permute.xlu1 %563 }
 0x2a3   : > { %v566_v53 = vsel %vm490_vm3, 0.0, %v564_v51 }
 0x2a4   : > { %v573_v54 = vrot.slane %v566_v53, 4 }
 0x2a6   : > { %v575_v57 = vadd.f32 %v573_v54, %v557_v44 }
 0x2a8   : > { %v579_v59 = vadd.f32 %v577_v56, %v575_v57 }
 0x2aa   : > { %v587_v60 = vadd.f32 %v585_v58, %v579_v59  ;;  %v596_v61 = vpop.permute.xlu1 %595 }
 0x2ab   : > { %v603_v62 = vmul.f32 %v596_v61, %v516_v34 }
 0x2ac   : > { %588 = vst.msk [vmem:[%s1043_s15 + $0x4] sm:$0xf0] %vm514_vm5, %v587_v60 }
 0x2ad   : > { %v617_v2 = vadd.f32 %v610_v63, %v603_v62 }
 0x2af   : > { %v619_v6 = vmax.f32 %v617_v2, 0.0 }
 0x2b2   : > { %v615_v4 = vpop.permute.xlu1 %614 }
 0x2b3   : > { %v590_v1 = vld [vmem:[%s1043_s15 + $0x8] sm:$0xf] }
 0x2b4   : > { %v604_v3 = vmul.f32 %v601_v0, %v590_v1 }
 0x2b6   : > { %v618_v5 = vadd.f32 %v615_v4, %v604_v3 }
 0x2b8   : > { %v620_v7 = vmax.f32 %v618_v5, 0.0 }
 0x2ba   : > { %v623_v10 = vpack.c.bf16 %v620_v7, %v619_v6  ;;  %v673_v19 = vpop.permute.xlu1 %672 }
 0x2bb   : > { %v674_v23 = vrot.slane %v673_v19, 4 }
 0x2bc   : > { %v635_v11 = vsel %vm633_vm8, %v623_v10, 0 }
 0x2bd   : > { %644 = vmatpush.bf16.msra.mxu2 %v635_v11 }
 0x2c0   : > { %776 = vmatmul.msk.bf16.vlgmr.msra.gmra.mxu2 %vm629_vm9, %v775_v12 }
 0x343   : > { %v646_v13 = vpop.f32.mrf.mxu2 }
 0x344   : > { %652 = vrot.lane.b32.xlu2 %v646_v13, %s898_s30  ;;  %s691_s30 = sshll.u32 %s1043_s15, 4  ;;  %s692_s30 = int_to_ptr.vmem [resolvable:$true] %s691_s30 }
 0x34b   : > { %v648_v14 = vpop.f32.mrf.mxu2 }
 0x34c   : > { %657 = vrot.lane.b32.xlu0 %v648_v14, %s899_s1  ;;  %s693_s1 = sshll.u32 %s690_s2, 4  ;;  %s694_s1 = int_to_ptr.hbm [resolvable:$true] %s693_s1 }
 0x34d   : > { %s847_s21 = sshra.s32 %s694_s1, 4  ;;  %s848_s21 = int_to_ptr.hbm [resolvable:$true] %s847_s21 }
 0x34e   : > { %s849_s23 = scalar_lea.hbm %s848_s21, 16  ;;  %p854_p0 = scmp.lt.s32.totalorder %s848_s21, %s1150_s13 }
 0x34f   : > { %p850_p11 = scmp.ne.s32.totalorder %s848_s21, %s849_s23  ;;  %p855_p1 = scmp.lt.s32.totalorder %s853_s17, %s849_s23 }
 0x351   : > { %p851_p12 = pnand %p850_p11, %p1010_p5  ;;  %p856_p2 = por %p855_p1, %p854_p0 }
 0x353   : > { %p852_p13 = pneg %p851_p12 }
 0x355   : > { %p857_p3 = pnand %p856_p2, %p852_p13 }
 0x39e   : > { %v653_v15 = vpop.permute.xlu2 %652 }
 0x39f   : > { %v655_v16 = vsel %vm490_vm3, 0.0, %v653_v15 }
 0x3a0   : > { %v662_v17 = vrot.slane %v655_v16, 4 }
 0x3a2   : > { %v664_v21 = vadd.f32 %v662_v17, %v646_v13 }
 0x3be   : > { %v658_v18 = vpop.permute.xlu0 %657 }
 0x3bf   : > { %v660_v20 = vsel %vm496_vm4, %v658_v18, 0.0 }
 0x3c0   : > { %v666_v22 = vrot.slane %v660_v20, 4 }
 0x3c2   : > { %v668_v24 = vadd.f32 %v666_v22, %v664_v21 }
 0x3c4   : > { %v676_v25 = vadd.f32 %v674_v23, %v668_v24 }
 0x3c6   : > { %677 = vst.msk [vmem:[%s1043_s15 + $0x8] sm:$0xf0] %vm514_vm5, %v676_v25 }
 0x3c7   : > { %860 = shalt.err (!%p857_p3)
}
 0x3c8   : > { %s900_s15 = smov 128   ;;  %s901_s29 = smov 8  }
 0x3c9   : > { %786 = dma.vmem_to_hbm [thread:$0]  (%p1010_p5), %s692_s30, 256, %s694_s1, %s679_s22, %s900_s15, %s900_s15, %s901_s29  }
 0x3ca PF: > { %p792_p4 = scmp.ge.s32.totalorder %s895_s28, 2  ;;  %s708_s24 = sand.u32 1, %s883_s25  }
 0x3cb   : > { %s709_s16 = scalar_lea.sflag [#allocation3], %s708_s24 }
 0x3cc   : > { %p789_p7 = pnand %p792_p4, %p1014_p6 }
 0x3ce   : > { %p790_p8 = pneg %p789_p7 }
 0x3d0   : > { %878 = dma.done.wait (%p790_p8), %s709_s16, 256  }
 0x3d1   : > { %880 = vsyncadd (%p790_p8), %s709_s16, 4294967040  ;;  %s1160_s21 = sld [smem:[#allocation5_spill]]  ;;  %p23_p9 = scmp.ge.s32.totalorder %s997_s14, 4  }
 0x3d2   : > { %s1161_s25 = smov %s887_s26  ;;  %s1162_s26 = smov %s891_s27 }
 0x3d3   : > { %s1164_s28 = smov %s997_s14  ;;  %25 = sbr.rel (!%p23_p9) target bundleno = 6 (0x6), region = 107 }
 0x3d7   : > { %s1163_s27 = smov %s1160_s21 }
 0x3d8   :  { %715 = vsyncpa [#allocation3], 1 }
 0x3d9   :  { %717 = vsyncpa [#allocation3 + $0x1], 1 }

</bundles_post_ra>
